<compile_context>
chip_gen: v6e
topology: v6e:2x2x1
jax: 0.10.0
libtpu: 0.0.40
codegen_flags: <defaults>
</compile_context>

<pallas_src>
import jax
import jax.numpy as jnp
from jax import lax
from jax.experimental import pallas as pl
from jax.experimental.pallas import tpu as pltpu


def _round_up(x, m):
    return (x + m - 1) // m * m


def _choose_tile_b(b_pad8):
    """Batch tile: >=2 tiles whenever possible (v7x megacore gets both TCs
    busy); 256 rows for large batches (matches the 256-wide MXU on v6e/v7x)."""
    if b_pad8 >= 512:
        return 256
    if b_pad8 >= 16:
        return _round_up((b_pad8 + 1) // 2, 8)   # exactly two tiles
    return b_pad8                                # tiny batch: one 8-row tile


def _flow_step(h, dt, w1h, w1t, b1, w2, b2):
    """One ResNet-flow step. h:(TB,HP) f32, dt:(TB,1) f32, w1h/w2 bf16.
    bf16 MXU operands with f32 accumulation; elementwise/tanh path stays f32
    (v5e has no bf16 VPU/EUP)."""
    z = (jnp.dot(h.astype(jnp.bfloat16), w1h,
                 preferred_element_type=jnp.float32)
         + dt * w1t + b1)                                    # (TB, DP) f32
    a1 = jnp.tanh(z)
    r = jnp.tanh(jnp.dot(a1.astype(jnp.bfloat16), w2,
                         preferred_element_type=jnp.float32) + b2)  # (TB, HP)
    return h + dt * r                                        # flow: out(dt=0)==h


def neural_flow_kernel(h_ref, dts_ref, w1h_ref, w1t_ref, b1_ref,
                       w2_ref, b2_ref, o_ref):
    """grid = (batch_tiles,).

    All N ODE steps run inside one in-kernel fori_loop with the state carried
    as an f32 value; HBM is touched exactly once per batch tile (read h,
    write o).  Weights/biases are loop-invariant and read once."""
    n_steps = dts_ref.shape[0]

    w1h = w1h_ref[...]
    w1t = w1t_ref[...]
    b1 = b1_ref[...]
    w2 = w2_ref[...]
    b2 = b2_ref[...]

    h0 = h_ref[...].astype(jnp.float32)

    def body(s, h):
        dt = dts_ref[s]                                      # (TILE_B, 1) f32
        return _flow_step(h, dt, w1h, w1t, b1, w2, b2)

    h_final = lax.fori_loop(0, n_steps, body, h0,
                            unroll=bool(n_steps <= 16))
    o_ref[...] = h_final.astype(o_ref.dtype)


def prepare_params(params):
    """Zero-pad weights once to lane-dense (multiple-of-128) shapes and cast
    the MXU operands to bf16.  Do this at init, not per call.

    NOTE: correctness of the fused multi-step loop relies on every padded
    row/column being exactly ZERO (so the padded state columns stay zero
    across steps).  Any future non-zero padding would silently contaminate
    real outputs after step 1."""
    w1h, w1t, b1, w2, b2 = params
    H, D = w1h.shape
    HP, DP = _round_up(H, 128), _round_up(D, 128)
    w1h_p = jnp.zeros((HP, DP), jnp.bfloat16).at[:H, :D].set(
        w1h.astype(jnp.bfloat16))
    w2_p = jnp.zeros((DP, HP), jnp.bfloat16).at[:D, :H].set(
        w2.astype(jnp.bfloat16))
    w1t_p = jnp.zeros((1, DP), jnp.float32).at[:, :D].set(w1t)
    b1_p = jnp.zeros((1, DP), jnp.float32).at[:, :D].set(b1)
    b2_p = jnp.zeros((1, HP), jnp.float32).at[:, :H].set(b2)
    return (w1h_p, w1t_p, b1_p, w2_p, b2_p)


def neural_flow_steps(hidden, dts, padded_params):
    """Apply the flow for dts.shape[0] consecutive steps in one pallas_call."""
    w1h, w1t, b1, w2, b2 = padded_params
    B, H = hidden.shape
    N = dts.shape[0]
    HP, DP = w1h.shape

    B8 = _round_up(B, 8)
    TILE_B = _choose_tile_b(B8)
    B_pad = _round_up(B8, TILE_B)

    h_p = jnp.zeros((B_pad, HP), hidden.dtype).at[:B, :H].set(hidden)
    dts_p = jnp.zeros((N, B_pad, 1), jnp.float32).at[:, :B, :].set(
        dts.astype(jnp.float32))

    itemsize = jnp.dtype(hidden.dtype).itemsize
    cost = pl.CostEstimate(
        flops=int(4 * N * B_pad * HP * DP),
        transcendentals=int(N * B_pad * (HP + DP)),
        bytes_accessed=int(2 * B_pad * HP * itemsize      # state in + out
                           + N * B_pad * 4                # dt slab
                           + 2 * HP * DP * 2              # bf16 weights
                           + (2 * DP + HP) * 4),          # biases / w1t
    )

    out = pl.pallas_call(
        neural_flow_kernel,
        out_shape=jax.ShapeDtypeStruct((B_pad, HP), hidden.dtype),
        grid_spec=pltpu.PrefetchScalarGridSpec(
            num_scalar_prefetch=0,
            grid=(B_pad // TILE_B,),
            in_specs=[
                pl.BlockSpec((TILE_B, HP), lambda b: (b, 0)),       # hidden
                pl.BlockSpec((N, TILE_B, 1), lambda b: (0, b, 0)),  # dt slab
                pl.BlockSpec((HP, DP), lambda b: (0, 0)),  # w1h (resident)
                pl.BlockSpec((1, DP), lambda b: (0, 0)),   # w1t (resident)
                pl.BlockSpec((1, DP), lambda b: (0, 0)),   # b1  (resident)
                pl.BlockSpec((DP, HP), lambda b: (0, 0)),  # w2  (resident)
                pl.BlockSpec((1, HP), lambda b: (0, 0)),   # b2  (resident)
            ],
            out_specs=pl.BlockSpec((TILE_B, HP), lambda b: (b, 0)),
        ),
        input_output_aliases={0: 0},   # reuse h_p's HBM buffer for the output
        compiler_params=pltpu.CompilerParams(
            dimension_semantics=("parallel",),
        ),
        cost_estimate=cost,
    )(h_p, dts_p, w1h, w1t, b1, w2, b2)
    return out[:B, :H]


def neural_flow(hidden, dt, padded_params):
    """NeuralFlow.forward(hidden, dt): a single flow step."""
    return neural_flow_steps(hidden, dt[None], padded_params)


# ----------------------- pure-JAX references -----------------------
def neural_flow_ref(hidden, dt, params, mxu_dtype=jnp.float32):
    w1h, w1t, b1, w2, b2 = params
    z = jnp.tanh(
        jnp.dot(hidden.astype(mxu_dtype), w1h.astype(mxu_dtype),
                preferred_element_type=jnp.float32) + dt * w1t + b1)
    r = jnp.tanh(
        jnp.dot(z.astype(mxu_dtype), w2.astype(mxu_dtype),
                preferred_element_type=jnp.float32) + b2)
    return hidden + dt * r


def neural_flow_steps_ref(hidden, dts, params, mxu_dtype=jnp.float32):
    h = hidden
    for s in range(dts.shape[0]):
        h = neural_flow_ref(h, dts[s], params, mxu_dtype)
    return h


if __name__ == "__main__":
    key = jax.random.PRNGKey(0)
    B, H, D = 8, 32, 64      # batch, hidden_dim, mlp hidden width
    N_STEPS = 4              # fused ODE steps demo

    ks = jax.random.split(key, 8)
    hidden = jax.random.normal(ks[0], (B, H), dtype=jnp.float32)
    dt = jax.random.uniform(ks[1], (B, 1), dtype=jnp.float32)
    dts = jax.random.uniform(ks[2], (N_STEPS, B, 1), dtype=jnp.float32)

    # Deterministic parameter init (synthetic weights, no checkpoint load).
    w1h = jax.random.normal(ks[3], (H, D), dtype=jnp.float32) * 0.1
    w1t = jax.random.normal(ks[4], (1, D), dtype=jnp.float32) * 0.1
    b1 = jnp.zeros((1, D), dtype=jnp.float32)
    w2 = jax.random.normal(ks[5], (D, H), dtype=jnp.float32) * 0.1
    b2 = jnp.zeros((1, H), dtype=jnp.float32)
    params = (w1h, w1t, b1, w2, b2)
    padded = prepare_params(params)

    # ---- single step (the module's forward) ----
    out = jax.block_until_ready(neural_flow(hidden, dt, padded))
    ref_bf16 = neural_flow_ref(hidden, dt, params, mxu_dtype=jnp.bfloat16)
    ref_f32 = neural_flow_ref(hidden, dt, params)
    assert out.shape == (B, H)
    assert jnp.allclose(out, ref_bf16, atol=2e-3, rtol=2e-3)
    assert jnp.allclose(out, ref_f32, atol=5e-2, rtol=5e-2)

    # ---- fused multi-step (one pallas_call, one grid cell, in-kernel loop) ----
    out_n = jax.block_until_ready(neural_flow_steps(hidden, dts, padded))
    refn_bf16 = neural_flow_steps_ref(hidden, dts, params,
                                      mxu_dtype=jnp.bfloat16)
    refn_f32 = neural_flow_steps_ref(hidden, dts, params)
    assert out_n.shape == (B, H)
    assert jnp.allclose(out_n, refn_bf16, atol=5e-3, rtol=5e-3)
    assert jnp.allclose(out_n, refn_f32, atol=1e-1, rtol=1e-1)

    print("KERNEL_OK")
</pallas_src>

<mosaic_0001>
module attributes {stable_mosaic.version = 11 : i64} {
  func.func @neural_flow_kernel(%arg0: i32, %arg1: memref<8x128xf32, #tpu.memory_space<vmem>>, %arg2: memref<1x8x1xf32, #tpu.memory_space<vmem>>, %arg3: memref<128x128xbf16, #tpu.memory_space<vmem>>, %arg4: memref<1x128xf32, #tpu.memory_space<vmem>>, %arg5: memref<1x128xf32, #tpu.memory_space<vmem>>, %arg6: memref<128x128xbf16, #tpu.memory_space<vmem>>, %arg7: memref<1x128xf32, #tpu.memory_space<vmem>>, %arg8: memref<8x128xf32, #tpu.memory_space<vmem>>) attributes {dimension_semantics = [#tpu.dimension_semantics<parallel>], iteration_bounds = array<i64: 1>, scalar_prefetch = 0 : i64, scratch_operands = 0 : i64, tpu.core_type = #tpu.core_type<tc>, window_params = [{transform_indices = @transform_0, window_bounds = array<i64: 8, 128>}, {transform_indices = @transform_1, window_bounds = array<i64: 1, 8, 1>}, {pipeline_mode = #tpu.pipeline_mode<synchronous>, transform_indices = @transform_2, window_bounds = array<i64: 128, 128>}, {pipeline_mode = #tpu.pipeline_mode<synchronous>, transform_indices = @transform_3, window_bounds = array<i64: 1, 128>}, {pipeline_mode = #tpu.pipeline_mode<synchronous>, transform_indices = @transform_4, window_bounds = array<i64: 1, 128>}, {pipeline_mode = #tpu.pipeline_mode<synchronous>, transform_indices = @transform_5, window_bounds = array<i64: 128, 128>}, {pipeline_mode = #tpu.pipeline_mode<synchronous>, transform_indices = @transform_6, window_bounds = array<i64: 1, 128>}, {transform_indices = @transform_7, window_bounds = array<i64: 8, 128>}]} {
    %c0 = arith.constant 0 : index
    %c0_0 = arith.constant 0 : index
    %0 = vector.load %arg3[%c0, %c0_0] : memref<128x128xbf16, #tpu.memory_space<vmem>>, vector<128x128xbf16>
    %c0_1 = arith.constant 0 : index
    %c0_2 = arith.constant 0 : index
    %1 = vector.load %arg4[%c0_1, %c0_2] : memref<1x128xf32, #tpu.memory_space<vmem>>, vector<1x128xf32>
    %c0_3 = arith.constant 0 : index
    %c0_4 = arith.constant 0 : index
    %2 = vector.load %arg5[%c0_3, %c0_4] : memref<1x128xf32, #tpu.memory_space<vmem>>, vector<1x128xf32>
    %c0_5 = arith.constant 0 : index
    %c0_6 = arith.constant 0 : index
    %3 = vector.load %arg6[%c0_5, %c0_6] : memref<128x128xbf16, #tpu.memory_space<vmem>>, vector<128x128xbf16>
    %c0_7 = arith.constant 0 : index
    %c0_8 = arith.constant 0 : index
    %4 = vector.load %arg7[%c0_7, %c0_8] : memref<1x128xf32, #tpu.memory_space<vmem>>, vector<1x128xf32>
    %c0_9 = arith.constant 0 : index
    %c0_10 = arith.constant 0 : index
    %5 = vector.load %arg1[%c0_9, %c0_10] : memref<8x128xf32, #tpu.memory_space<vmem>>, vector<8x128xf32>
    %c0_i32 = arith.constant 0 : i32
    %6 = arith.index_cast %c0_i32 : i32 to index
    %c0_11 = arith.constant 0 : index
    %c0_12 = arith.constant 0 : index
    %7 = vector.load %arg2[%6, %c0_11, %c0_12] : memref<1x8x1xf32, #tpu.memory_space<vmem>>, vector<1x8x1xf32>
    %8 = vector.shape_cast %7 : vector<1x8x1xf32> to vector<8x1xf32>
    %9 = arith.truncf %5 : vector<8x128xf32> to vector<8x128xbf16>
    %cst = arith.constant dense<0.000000e+00> : vector<8x128xf32>
    %10 = tpu.matmul %9, %0, %cst {dimension_numbers = #tpu.dot_dimension_numbers<[1], [0], [0], [1], [0, 0, 1, 1], [], []>} : vector<8x128xbf16>, vector<128x128xbf16>, vector<8x128xf32> -> vector<8x128xf32>
    %11 = vector.broadcast %8 : vector<8x1xf32> to vector<8x128xf32>
    %12 = vector.broadcast %1 : vector<1x128xf32> to vector<8x128xf32>
    %13 = arith.mulf %11, %12 : vector<8x128xf32>
    %14 = arith.addf %10, %13 : vector<8x128xf32>
    %15 = vector.broadcast %2 : vector<1x128xf32> to vector<8x128xf32>
    %16 = arith.addf %14, %15 : vector<8x128xf32>
    %17 = math.tanh %16 : vector<8x128xf32>
    %18 = arith.truncf %17 : vector<8x128xf32> to vector<8x128xbf16>
    %cst_13 = arith.constant dense<0.000000e+00> : vector<8x128xf32>
    %19 = tpu.matmul %18, %3, %cst_13 {dimension_numbers = #tpu.dot_dimension_numbers<[1], [0], [0], [1], [0, 0, 1, 1], [], []>} : vector<8x128xbf16>, vector<128x128xbf16>, vector<8x128xf32> -> vector<8x128xf32>
    %20 = vector.broadcast %4 : vector<1x128xf32> to vector<8x128xf32>
    %21 = arith.addf %19, %20 : vector<8x128xf32>
    %22 = math.tanh %21 : vector<8x128xf32>
    %23 = vector.broadcast %8 : vector<8x1xf32> to vector<8x128xf32>
    %24 = arith.mulf %23, %22 : vector<8x128xf32>
    %25 = arith.addf %5, %24 : vector<8x128xf32>
    %c1_i32 = arith.constant 1 : i32
    %c0_14 = arith.constant 0 : index
    %c0_15 = arith.constant 0 : index
    %26 = vector.load %arg8[%c0_14, %c0_15] : memref<8x128xf32, #tpu.memory_space<vmem>>, vector<8x128xf32>
    tpu.vector_store %arg8[%c0_14, %c0_15], %25 {strides = array<i32>} : memref<8x128xf32, #tpu.memory_space<vmem>>, vector<8x128xf32>,
    return
  }
  func.func @transform_0(%arg0: i32) -> (i32, i32) {
    %c0_i32 = arith.constant 0 : i32
    %c0_i32_0 = arith.constant 0 : i32
    return %arg0, %c0_i32 : i32, i32
  }
  func.func @transform_1(%arg0: i32) -> (i32, i32, i32) {
    %c0_i32 = arith.constant 0 : i32
    %c0_i32_0 = arith.constant 0 : i32
    %c0_i32_1 = arith.constant 0 : i32
    return %c0_i32, %arg0, %c0_i32_0 : i32, i32, i32
  }
  func.func @transform_2(%arg0: i32) -> (i32, i32) {
    %c0_i32 = arith.constant 0 : i32
    %c0_i32_0 = arith.constant 0 : i32
    %c0_i32_1 = arith.constant 0 : i32
    return %c0_i32, %c0_i32_0 : i32, i32
  }
  func.func @transform_3(%arg0: i32) -> (i32, i32) {
    %c0_i32 = arith.constant 0 : i32
    %c0_i32_0 = arith.constant 0 : i32
    %c0_i32_1 = arith.constant 0 : i32
    return %c0_i32, %c0_i32_0 : i32, i32
  }
  func.func @transform_4(%arg0: i32) -> (i32, i32) {
    %c0_i32 = arith.constant 0 : i32
    %c0_i32_0 = arith.constant 0 : i32
    %c0_i32_1 = arith.constant 0 : i32
    return %c0_i32, %c0_i32_0 : i32, i32
  }
  func.func @transform_5(%arg0: i32) -> (i32, i32) {
    %c0_i32 = arith.constant 0 : i32
    %c0_i32_0 = arith.constant 0 : i32
    %c0_i32_1 = arith.constant 0 : i32
    return %c0_i32, %c0_i32_0 : i32, i32
  }
  func.func @transform_6(%arg0: i32) -> (i32, i32) {
    %c0_i32 = arith.constant 0 : i32
    %c0_i32_0 = arith.constant 0 : i32
    %c0_i32_1 = arith.constant 0 : i32
    return %c0_i32, %c0_i32_0 : i32, i32
  }
  func.func @transform_7(%arg0: i32) -> (i32, i32) {
    %c0_i32 = arith.constant 0 : i32
    %c0_i32_0 = arith.constant 0 : i32
    return %arg0, %c0_i32 : i32, i32
  }
}

</mosaic_0001>

<bundles_post_ra>
// kernel: tpu_custom_call.1
= control target key start
LH: loop header
LB: loop body
LE: loop exit
PB: predicated region body
PF: predicated region fallthrough
CT: control target
= control target key end

     0   :  { %12 = vsyncpa [#allocation3], 0  ;;  %s594_s0 = inlined_call_operand.hbm [shape: f32[8,128], index: 0, kind: input, shape index: {}, may-alias: {0,7}]   ;;  %s595_s1 = inlined_call_operand.vmem [shape: f32[1,8,1], index: 1, kind: input, shape index: {}]   ;;  %s596_s2 = inlined_call_operand.hbm [shape: bf16[128,128], index: 2, kind: input, shape index: {}]   ;;  %s597_s3 = inlined_call_operand.vmem [shape: f32[1,128], index: 3, kind: input, shape index: {}]   ;;  %s598_s4 = inlined_call_operand.vmem [shape: f32[1,128], index: 4, kind: input, shape index: {}]   ;;  %s599_s5 = inlined_call_operand.hbm [shape: bf16[128,128], index: 5, kind: input, shape index: {}]   ;;  %s600_s6 = inlined_call_operand.vmem [shape: f32[1,128], index: 6, kind: input, shape index: {}]   ;;  %s601_s7 = inlined_call_operand.hbm [shape: f32[8,128], index: 7, kind: output, shape index: {}, may-alias: {0,7}]  }
   0x1   :  { %13 = vsyncpa [#allocation6], 0 }
   0x2   :  { %14 = vsyncpa [#allocation4], 0  ;;  %s521_s24 = smov [#allocation5]  }
   0x3   :  { %s32_s25 = sshll.u32 %s521_s24, 4  ;;  %s33_s25 = int_to_ptr.vmem [resolvable:$true] %s32_s25 }
   0x4   :  { %s443_s26 = scalar_lea.vmem %s33_s25, 1024  ;;  %p448_p1 = scmp.lt.s32.totalorder %s33_s25, %s33_s25 }
   0x5   :  { %p444_p0 = scmp.ne.s32.totalorder %s33_s25, %s443_s26  ;;  %p449_p2 = scmp.lt.s32.totalorder %s443_s26, %s443_s26 }
   0x7   :  { %p450_p3 = por %p449_p2, %p448_p1 }
   0x9   :  { %p451_p4 = pnand %p450_p3, %p444_p0 }
   0xb   :  { %454 = shalt.err (!%p451_p4)
}
   0xc   :  { %s522_s27 = smov 64   ;;  %s523_s28 = smov 4  }
   0xd   :  { %38 = dma.hbm_to_vmem [thread:$0]  %s596_s2, 1024, %s33_s25, [#allocation6], %s522_s27, %s522_s27, %s523_s28  }
   0xe   :  { %s524_s8 = smov [#allocation2]   ;;  %s525_s10 = smov [#allocation7]  }
   0xf   :  { %s21_s9 = sshll.u32 %s524_s8, 4  ;;  %s48_s11 = sshll.u32 %s525_s10, 4  ;;  %s22_s9 = int_to_ptr.vmem [resolvable:$true] %s21_s9  ;;  %s49_s11 = int_to_ptr.vmem [resolvable:$true] %s48_s11 }
  0x10   :  { %s463_s12 = scalar_lea.vmem %s22_s9, 128  ;;  %p468_p6 = scmp.lt.s32.totalorder %s22_s9, %s22_s9 }
  0x11   :  { %p464_p5 = scmp.ne.s32.totalorder %s22_s9, %s463_s12  ;;  %p469_p7 = scmp.lt.s32.totalorder %s463_s12, %s463_s12 }
  0x13   :  { %p470_p8 = por %p469_p7, %p468_p6 }
  0x15   :  { %p471_p9 = pnand %p470_p8, %p464_p5 }
  0x17   :  { %474 = shalt.err (!%p471_p9)
}
  0x18   :  { %24 = dma.hbm_to_vmem [thread:$0]  %s594_s0, 128, %s22_s9, [#allocation3]  }
  0x19   :  { %s483_s15 = scalar_lea.vmem %s49_s11, 1024  ;;  %p488_p11 = scmp.lt.s32.totalorder %s49_s11, %s49_s11 }
  0x1a   :  { %p484_p10 = scmp.ne.s32.totalorder %s49_s11, %s483_s15  ;;  %p489_p12 = scmp.lt.s32.totalorder %s483_s15, %s483_s15 }
  0x1c   :  { %p490_p13 = por %p489_p12, %p488_p11 }
  0x1e   :  { %p491_p0 = pnand %p490_p13, %p484_p10 }
  0x20   :  { %494 = shalt.err (!%p491_p0)
}
  0x21   :  { %54 = dma.hbm_to_vmem [thread:$0]  %s599_s5, 1024, %s49_s11, [#allocation6], %s522_s27, %s522_s27, %s523_s28  }
  0x22   :  { %515 = dma.done.wait [#allocation3], 128  }
  0x23   :  { %516 = vsyncadd [#allocation3], 4294967168 }
  0x24   :  { %517 = dma.done.wait [#allocation6], 2048  }
  0x25   :  { %518 = vsyncadd [#allocation6], 4294965248  ;;  %v526_v0 = vmov 0.0   ;;  %vm527_vm0 = vmmov 0   ;;  %v528_v1 = vmov 0   ;;  %v415_v2 = vld [vmem:[#allocation5 + $0x38] sm:$0xff]  }
  0x26   :  { %365 = vmatprep.subr.bf16.mxu0 %v526_v0  ;;  %381 = vmatprep.mubr.msk.bf16.mxu0 %vm527_vm0, %v526_v0  ;;  %v416_v3 = vld [vmem:[#allocation5 + $0x30] sm:$0xff]   ;;  %v417_v4 = vld [vmem:[#allocation5 + $0x28] sm:$0xff]   ;;  %v103_v5 = vld [vmem:[%s595_s1] sm:$0xff] }
  0x27   :  { %414 = vset.pattern.permute.xlu0 %v528_v1  ;;  %385 = vmatprep.subr.bf16.mxu1 %v526_v0  ;;  %v423_v6 = vld [vmem:[#allocation7 + $0x38] sm:$0xff]   ;;  %v418_v7 = vld [vmem:[#allocation5 + $0x20] sm:$0xff]   ;;  %v424_v8 = vld [vmem:[#allocation7 + $0x30] sm:$0xff]  }
  0x28   :  { %401 = vmatprep.mubr.msk.bf16.mxu1 %vm527_vm0, %v526_v0  ;;  %366 = vmatpush3.bf16.msra.mxu0 %v415_v2  ;;  %v419_v9 = vld [vmem:[#allocation5 + $0x18] sm:$0xff]   ;;  %v425_v10 = vld [vmem:[#allocation7 + $0x28] sm:$0xff]   ;;  %v420_v11 = vld [vmem:[#allocation5 + $0x10] sm:$0xff]  }
  0x29   :  { %367 = vmatprep.subr.bf16.mxu0 %v526_v0  ;;  %107 = vperm.xlu0 %414, %v103_v5   ;;  %v421_v12 = vld [vmem:[#allocation5 + $0x8] sm:$0xff]   ;;  %v422_v13 = vld [vmem:[#allocation5] sm:$0xff]   ;;  %v102_v14 = vld [vmem:[#allocation2] sm:$0xff] }
  0x2a   :  { %386 = vmatpush3.bf16.msra.mxu1 %v423_v6  ;;  %v104_v15 = vpack.c.bf16 %v102_v14, %v102_v14  ;;  %v426_v16 = vld [vmem:[#allocation7 + $0x20] sm:$0xff]   ;;  %v427_v17 = vld [vmem:[#allocation7 + $0x18] sm:$0xff]   ;;  %v428_v18 = vld [vmem:[#allocation7 + $0x10] sm:$0xff]  }
  0x2b   :  { %387 = vmatprep.subr.bf16.mxu1 %v526_v0  ;;  %v429_v19 = vld [vmem:[#allocation7 + $0x8] sm:$0xff]   ;;  %v430_v20 = vld [vmem:[#allocation7] sm:$0xff]   ;;  %v328_v22 = vld [vmem:[%s597_s3] ss:$0 sm:$0xff]  ;;  %s529_s3 = smov [#allocation8]  }
  0x2c   :  { %368 = vmatpush3.bf16.msra.mxu0 %v416_v3  ;;  %v337_v24 = vld [vmem:[%s598_s4] ss:$0 sm:$0xff]  ;;  %s318_s4 = sshll.u32 %s529_s3, 4  ;;  %s319_s4 = int_to_ptr.vmem [resolvable:$true] %s318_s4 }
  0x2d   :  { %369 = vmatprep.subr.bf16.mxu0 %v526_v0  ;;  %v338_v33 = vld [vmem:[%s600_s6] ss:$0 sm:$0xff]  ;;  %s495_s22 = scalar_lea.vmem %s319_s4, 128  ;;  %p500_p2 = scmp.lt.s32.totalorder %s319_s4, %s319_s4 }
  0x2e   :  { %388 = vmatpush3.bf16.msra.mxu1 %v424_v8  ;;  %p496_p1 = scmp.ne.s32.totalorder %s319_s4, %s495_s22  ;;  %p501_p3 = scmp.lt.s32.totalorder %s495_s22, %s495_s22 }
  0x2f   :  { %389 = vmatprep.subr.bf16.mxu1 %v526_v0 }
  0x30   :  { %370 = vmatpush3.bf16.msra.mxu0 %v417_v4  ;;  %p502_p4 = por %p501_p3, %p500_p2 }
  0x31   :  { %371 = vmatprep.subr.bf16.mxu0 %v526_v0 }
  0x32   :  { %390 = vmatpush3.bf16.msra.mxu1 %v425_v10  ;;  %p503_p5 = pnand %p502_p4, %p496_p1 }
  0x33   :  { %391 = vmatprep.subr.bf16.mxu1 %v526_v0 }
  0x34   :  { %372 = vmatpush3.bf16.msra.mxu0 %v418_v7 }
  0x35   :  { %373 = vmatprep.subr.bf16.mxu0 %v526_v0 }
  0x36   :  { %392 = vmatpush3.bf16.msra.mxu1 %v426_v16 }
  0x37   :  { %393 = vmatprep.subr.bf16.mxu1 %v526_v0 }
  0x38   :  { %374 = vmatpush3.bf16.msra.mxu0 %v419_v9 }
  0x39   :  { %375 = vmatprep.subr.bf16.mxu0 %v526_v0 }
  0x3a   :  { %394 = vmatpush3.bf16.msra.mxu1 %v427_v17 }
  0x3b   :  { %395 = vmatprep.subr.bf16.mxu1 %v526_v0 }
  0x3c   :  { %376 = vmatpush3.bf16.msra.mxu0 %v420_v11 }
  0x3d   :  { %377 = vmatprep.subr.bf16.mxu0 %v526_v0 }
  0x3e   :  { %396 = vmatpush3.bf16.msra.mxu1 %v428_v18 }
  0x3f   :  { %397 = vmatprep.subr.bf16.mxu1 %v526_v0 }
  0x40   :  { %378 = vmatpush3.bf16.msra.mxu0 %v421_v12 }
  0x41   :  { %379 = vmatprep.subr.bf16.mxu0 %v526_v0 }
  0x42   :  { %398 = vmatpush3.bf16.msra.mxu1 %v429_v19 }
  0x43   :  { %399 = vmatprep.subr.bf16.mxu1 %v526_v0 }
  0x44   :  { %380 = vmatpush3.bf16.msra.mxu0 %v422_v13 }
  0x46   :  { %400 = vmatpush3.bf16.msra.mxu1 %v430_v20 }
  0x47   :  { %382 = vmatmul.mubr.bf16.vlgmr.msra.gmra.mxu0 %v104_v15 }
  0xa4   :  { %v108_v21 = vpop.permute.xlu0 %107 }
  0xa5   :  { %v116_v23 = vmul.f32 %v328_v22, %v108_v21 }
 0x107   :  { %v199_v25 = vpop.f32.mrf.mxu0 }
 0x108   :  { %v200_v26 = vadd.f32 %v199_v25, %v116_v23 }
 0x109   :  { %v383_v27 = vpop.f32.mrf.mxu0 }
 0x10a   :  { %v211_v28 = vadd.f32 %v337_v24, %v200_v26 }
 0x10b   :  { %v202_v29 = vpop.f32.mrf.mxu0 }
 0x10c   :  { %431 = vtanh.f32 %v211_v28 }
 0x10d   :  { %v384_v30 = vpop.f32.mrf.mxu0 }
 0x119   :  { %v432_v31 = vpop.eup %431 }
 0x11a   :  { %v213_v32 = vpack.c.bf16 %v432_v31, %v432_v31 }
 0x11c   :  { %402 = vmatmul.mubr.bf16.vlgmr.msra.gmra.mxu1 %v213_v32 }
 0x1dc   :  { %v302_v34 = vpop.f32.mrf.mxu1 }
 0x1dd   :  { %v303_v35 = vadd.f32 %v338_v33, %v302_v34 }
 0x1de   :  { %v403_v36 = vpop.f32.mrf.mxu1 }
 0x1df   :  { %433 = vtanh.f32 %v303_v35 }
 0x1e0   :  { %v305_v37 = vpop.f32.mrf.mxu1 }
 0x1e2   :  { %v404_v38 = vpop.f32.mrf.mxu1 }
 0x1ec   :  { %v434_v39 = vpop.eup %433 }
 0x1ed   :  { %v309_v40 = vmul.f32 %v434_v39, %v108_v21 }
 0x1ef   :  { %v310_v41 = vadd.f32 %v309_v40, %v102_v14 }
 0x1f1   :  { %311 = vst [vmem:[#allocation8] sm:$0xff] %v310_v41 }
 0x1f2   :  { %506 = shalt.err (!%p503_p5)
}
 0x1f3   :  { %321 = dma.vmem_to_hbm [thread:$0]  %s319_s4, 128, %s601_s7, [#allocation4]  }
 0x1f4   :  { %519 = dma.done.wait [#allocation4], 128  }
 0x1f5   :  { %520 = vsyncadd [#allocation4], 4294967168 }
 0x1f6   :  { %325 = vsyncpa [#allocation3], 1 }
 0x1f7   :  { %326 = vsyncpa [#allocation6], 1 }
 0x1f8   :  { %327 = vsyncpa [#allocation4], 1 }

</bundles_post_ra>
